<compile_context>
chip_gen: v7x
topology: tpu7x:2x2x1
jax: 0.10.0
libtpu: 0.0.40
codegen_flags: <defaults>
</compile_context>

<pallas_src>
from functools import partial

import jax
import jax.numpy as jnp
from jax.experimental import pallas as pl
from jax.experimental.pallas import tpu as pltpu

HIDDEN = 128       # block output width
HEADS_PAD = 128    # action logits + value, padded to a full lane tile
TOTAL = HIDDEN + HEADS_PAD


def fused_policy_kernel(x_ref, h_ref, wx_ref, wh_ref, b_ref, out_ref, *, n_act):
    wx = wx_ref[...]                                 # (obs_dim, 256), f32 or bf16
    wh = wh_ref[...]                                 # (128, 256),     f32 or bf16
    x = x_ref[...].astype(wx.dtype)                  # cast only the MXU operands
    h = h_ref[...].astype(wh.dtype)

    # Single fused pre-activation: 2 MXU dots (f32 accumulation) + f32 bias add.
    pre = (jnp.dot(x, wx, preferred_element_type=jnp.float32)
           + jnp.dot(h, wh, preferred_element_type=jnp.float32)
           + b_ref[...])                             # (tm, 256) f32

    hid = pre[:, :HIDDEN]                            # tile-aligned lane slices
    heads = pre[:, HIDDEN:]                          # (tm, 128): [logits | value | pad]

    # new_hidden = relu(block(x))  -> lanes [0, 128) of the fused output slab.
    out_ref[:, :HIDDEN] = jnp.maximum(hid, 0.0)

    # Softmax over the first n_act lanes of the heads slab (padded lanes -> -inf).
    lane = jax.lax.broadcasted_iota(jnp.int32, heads.shape, 1)
    is_logit = lane < n_act
    logits = jnp.where(is_logit, heads, -jnp.inf)
    m = jnp.max(logits, axis=-1, keepdims=True)
    e = jnp.exp(logits - m)                          # padded lanes -> exp(-inf) = 0
    denom = jnp.sum(e, axis=-1, keepdims=True)
    prob = e * pl.reciprocal(denom, approx=False)    # exact: approx breaks 1e-5 tol

    # Lanes [128, 256) of the fused output: [prob (n_act) | value (1) | zeros].
    out_ref[:, HIDDEN:] = jnp.where(is_logit, prob,
                                    jnp.where(lane == n_act, heads, 0.0))


@partial(jax.jit, static_argnames=("n_act", "tm", "bp"))
def _policy_forward_jit(x, h, wx, wh, b, *, n_act, tm, bp):
    """Whole wrapper under one jit: pad, pallas_call, and output slicing fuse together.

    x: (B, obs_dim) f32, h: (B, 128) f32; bp = padded batch (multiple of tm, tm % 8 == 0).
    """
    B, obs_dim = x.shape
    if bp != B:
        x = jnp.pad(x, ((0, bp - B), (0, 0)))
        h = jnp.pad(h, ((0, bp - B), (0, 0)))

    kernel = partial(fused_policy_kernel, n_act=n_act)
    out = pl.pallas_call(
        kernel,
        out_shape=jax.ShapeDtypeStruct((bp, TOTAL), jnp.float32),
        grid=(bp // tm,),
        in_specs=[
            pl.BlockSpec((tm, obs_dim), lambda i: (i, 0)),      # x tile
            pl.BlockSpec((tm, HIDDEN), lambda i: (i, 0)),       # h tile
            pl.BlockSpec((obs_dim, TOTAL), lambda i: (0, 0)),   # fused x-weights (resident)
            pl.BlockSpec((HIDDEN, TOTAL), lambda i: (0, 0)),    # fused h-weights (resident)
            pl.BlockSpec((1, TOTAL), lambda i: (0, 0)),         # fused bias (resident, f32)
        ],
        out_specs=pl.BlockSpec((tm, TOTAL), lambda i: (i, 0)),  # single fused output slab
        compiler_params=pltpu.CompilerParams(
            dimension_semantics=("parallel",)),                 # shard batch across TCs (v7x)
    )(x, h, wx, wh, b)

    newh = out[:B, :HIDDEN]
    prob = out[:B, HIDDEN:HIDDEN + n_act]
    val = out[:B, HIDDEN + n_act:HIDDEN + n_act + 1]
    return prob, val, newh


def _choose_tiling(B):
    """Batch tile tm (multiple of 8, <=512) and padded batch bp (multiple of tm).

    Keeps >=2 grid steps once the padded batch reaches 16 rows so the 'parallel'
    grid axis can engage v7x's second TensorCore; harmless on single-TC chips.
    """
    b8 = -(-B // 8) * 8
    if b8 >= 16:
        tm = max(8, min(512, (b8 // 2) // 8 * 8))
    else:
        tm = b8
    bp = -(-b8 // tm) * tm
    return tm, bp


def build_fused_slabs(params, obs_dim, n_act, hidden=HIDDEN, weight_dtype=jnp.float32):
    """One-time host-side layout prep (PyTorch (out,in) weights -> fused kernel slabs).

    weight_dtype=jnp.bfloat16 enables the bf16 MXU fast path on v6e/v7x (halved
    weight bytes); bias stays f32 (added after the f32-accumulating dots).
    """
    assert hidden == HIDDEN and n_act + 1 <= HEADS_PAD
    wb_t = params["w_block"].T                       # (obs_dim, 128)
    wa_t = params["w_action"].T                      # (obs_dim+128, n_act)
    wv_t = params["w_value"].T                       # (obs_dim+128, 1)

    wx = jnp.zeros((obs_dim, TOTAL), jnp.float32)
    wx = wx.at[:, :hidden].set(wb_t)
    wx = wx.at[:, hidden:hidden + n_act].set(wa_t[:obs_dim])
    wx = wx.at[:, hidden + n_act:hidden + n_act + 1].set(wv_t[:obs_dim])

    wh = jnp.zeros((hidden, TOTAL), jnp.float32)
    wh = wh.at[:, hidden:hidden + n_act].set(wa_t[obs_dim:])
    wh = wh.at[:, hidden + n_act:hidden + n_act + 1].set(wv_t[obs_dim:])

    b = jnp.zeros((1, TOTAL), jnp.float32)
    b = b.at[0, :hidden].set(params["b_block"])
    b = b.at[0, hidden:hidden + n_act].set(params["b_action"])
    b = b.at[0, hidden + n_act].set(params["b_value"][0])

    return {"wx": jax.device_put(wx.astype(weight_dtype)),
            "wh": jax.device_put(wh.astype(weight_dtype)),
            "b": jax.device_put(b),
            "obs_dim": obs_dim, "n_act": n_act, "hidden": hidden}


def policy_delay_skip_forward_batched(slabs, x, h):
    """x: (B, obs_dim), h: (B, 128)  ->  prob (B, n_act), value (B, 1), [new_hidden (B, 128)]."""
    B = x.shape[0]
    tm, bp = _choose_tiling(B)
    prob, val, newh = _policy_forward_jit(
        x, h, slabs["wx"], slabs["wh"], slabs["b"],
        n_act=slabs["n_act"], tm=tm, bp=bp)
    return prob, val, [newh]


@partial(jax.jit, static_argnames=("n_act",))
def _policy_forward_single_xla(x, h, wx, wh, b, *, n_act):
    """Plain-XLA B=1 path (perf review: at B=1 a pallas_call is pure dispatch overhead)."""
    pre = x @ wx.astype(jnp.float32) + h @ wh.astype(jnp.float32) + b[0]
    newh = jnp.maximum(pre[:HIDDEN], 0.0)
    prob = jax.nn.softmax(pre[HIDDEN:HIDDEN + n_act], axis=-1)
    val = pre[HIDDEN + n_act:HIDDEN + n_act + 1]
    return prob, val, newh


def policy_delay_skip_forward(slabs, x, hidden_acts, use_pallas=True):
    """Single-observation API matching the PyTorch forward(x, hidden_acts)."""
    if use_pallas:
        prob, val, newh = policy_delay_skip_forward_batched(
            slabs, x[None, :], hidden_acts[0][None, :])
        return prob[0], val[0], [newh[0][0]]
    prob, val, newh = _policy_forward_single_xla(
        x, hidden_acts[0], slabs["wx"], slabs["wh"], slabs["b"], n_act=slabs["n_act"])
    return prob, val, [newh]


# ----------------------------------------------------------------------------- test utils
def _init_params(key, obs_dim, n_act, hidden=HIDDEN):
    ks = jax.random.split(key, 6)
    scale = 0.1
    return {
        "w_block": scale * jax.random.normal(ks[0], (hidden, obs_dim), jnp.float32),
        "b_block": scale * jax.random.normal(ks[1], (hidden,), jnp.float32),
        "w_action": scale * jax.random.normal(ks[2], (n_act, obs_dim + hidden), jnp.float32),
        "b_action": scale * jax.random.normal(ks[3], (n_act,), jnp.float32),
        "w_value": scale * jax.random.normal(ks[4], (1, obs_dim + hidden), jnp.float32),
        "b_value": scale * jax.random.normal(ks[5], (1,), jnp.float32),
    }


def _reference(x, h0, p):
    last = jnp.concatenate([x, h0], axis=0)
    newh = jnp.maximum(p["w_block"] @ x + p["b_block"], 0.0)
    prob = jax.nn.softmax(p["w_action"] @ last + p["b_action"], axis=-1)
    val = p["w_value"] @ last + p["b_value"]
    return prob, val, newh


if __name__ == "__main__":
    obs_dim, n_act, hidden = 8, 4, HIDDEN
    key = jax.random.PRNGKey(0)
    kx, kb, kc, kp = jax.random.split(key, 4)

    params = _init_params(kp, obs_dim, n_act, hidden)
    slabs = build_fused_slabs(params, obs_dim, n_act, hidden)            # f32 (strict) slabs

    # --- single-observation path (matches PyTorch forward(x, hidden_acts)) ---
    x = jax.random.normal(kx, (obs_dim,), jnp.float32)
    h0 = jnp.maximum(params["w_block"] @ x + params["b_block"], 0.0)     # get_init_hidden(x)
    prob, val, new_hidden = policy_delay_skip_forward(slabs, x, [h0])
    jax.block_until_ready((prob, val, new_hidden[0]))

    ref_prob, ref_val, ref_newh = _reference(x, h0, params)
    assert prob.shape == (n_act,) and val.shape == (1,) and new_hidden[0].shape == (hidden,)
    assert jnp.allclose(prob, ref_prob, atol=1e-5), "action_prob mismatch"
    assert jnp.allclose(val, ref_val, atol=1e-5), "state_value mismatch"
    assert jnp.allclose(new_hidden[0], ref_newh, atol=1e-5), "new_hidden mismatch"

    # plain-XLA B=1 fallback (perf-review path) must agree too
    prob2, val2, newh2 = policy_delay_skip_forward(slabs, x, [h0], use_pallas=False)
    jax.block_until_ready((prob2, val2, newh2[0]))
    assert jnp.allclose(prob2, ref_prob, atol=1e-5), "xla action_prob mismatch"
    assert jnp.allclose(val2, ref_val, atol=1e-5), "xla state_value mismatch"
    assert jnp.allclose(newh2[0], ref_newh, atol=1e-5), "xla new_hidden mismatch"

    # --- batched path, no padding needed (B=16 -> tm=8, grid=(2,)) ---
    B = 16
    xb = jax.random.normal(kb, (B, obs_dim), jnp.float32)
    hb = jnp.maximum(xb @ params["w_block"].T + params["b_block"], 0.0)
    pb, vb, nb = policy_delay_skip_forward_batched(slabs, xb, hb)
    jax.block_until_ready((pb, vb, nb[0]))
    rpb, rvb, rnb = jax.vmap(lambda xx, hh: _reference(xx, hh, params))(xb, hb)
    assert jnp.allclose(pb, rpb, atol=1e-5), "batched action_prob mismatch"
    assert jnp.allclose(vb, rvb, atol=1e-5), "batched state_value mismatch"
    assert jnp.allclose(nb[0], rnb, atol=1e-5), "batched new_hidden mismatch"

    # --- batched path exercising in-jit padding (B=20 -> padded to 24, tm=8, grid=(3,)) ---
    B2 = 20
    xc = jax.random.normal(kc, (B2, obs_dim), jnp.float32)
    hc = jnp.maximum(xc @ params["w_block"].T + params["b_block"], 0.0)
    pc, vc, nc = policy_delay_skip_forward_batched(slabs, xc, hc)
    jax.block_until_ready((pc, vc, nc[0]))
    rpc, rvc, rnc = jax.vmap(lambda xx, hh: _reference(xx, hh, params))(xc, hc)
    assert jnp.allclose(pc, rpc, atol=1e-5), "padded action_prob mismatch"
    assert jnp.allclose(vc, rvc, atol=1e-5), "padded state_value mismatch"
    assert jnp.allclose(nc[0], rnc, atol=1e-5), "padded new_hidden mismatch"

    # --- bf16 matmul-operand path (v6e/v7x fast path), bf16-appropriate tolerance ---
    slabs_bf16 = build_fused_slabs(params, obs_dim, n_act, hidden,
                                   weight_dtype=jnp.bfloat16)
    pbf, vbf, nbf = policy_delay_skip_forward_batched(slabs_bf16, xb, hb)
    jax.block_until_ready((pbf, vbf, nbf[0]))
    assert jnp.allclose(pbf, rpb, atol=5e-2), "bf16 action_prob mismatch"
    assert jnp.allclose(vbf, rvb, atol=5e-2), "bf16 state_value mismatch"
    assert jnp.allclose(nbf[0], rnb, atol=5e-2), "bf16 new_hidden mismatch"

    print("KERNEL_OK")
</pallas_src>

<mosaic_0001>
module attributes {stable_mosaic.version = 11 : i64} {
  func.func @fused_policy_kernel(%arg0: i32, %arg1: memref<8x8xf32, #tpu.memory_space<vmem>>, %arg2: memref<8x128xf32, #tpu.memory_space<vmem>>, %arg3: memref<8x256xf32, #tpu.memory_space<vmem>>, %arg4: memref<128x256xf32, #tpu.memory_space<vmem>>, %arg5: memref<1x256xf32, #tpu.memory_space<vmem>>, %arg6: memref<8x256xf32, #tpu.memory_space<vmem>>) attributes {dimension_semantics = [#tpu.dimension_semantics<parallel>], iteration_bounds = array<i64: 1>, scalar_prefetch = 0 : i64, scratch_operands = 0 : i64, tpu.core_type = #tpu.core_type<tc>, window_params = [{transform_indices = @transform_0, window_bounds = array<i64: 8, 8>}, {transform_indices = @transform_1, window_bounds = array<i64: 8, 128>}, {pipeline_mode = #tpu.pipeline_mode<synchronous>, transform_indices = @transform_2, window_bounds = array<i64: 8, 256>}, {pipeline_mode = #tpu.pipeline_mode<synchronous>, transform_indices = @transform_3, window_bounds = array<i64: 128, 256>}, {pipeline_mode = #tpu.pipeline_mode<synchronous>, transform_indices = @transform_4, window_bounds = array<i64: 1, 256>}, {transform_indices = @transform_5, window_bounds = array<i64: 8, 256>}]} {
    %c0 = arith.constant 0 : index
    %c0_0 = arith.constant 0 : index
    %0 = vector.load %arg3[%c0, %c0_0] : memref<8x256xf32, #tpu.memory_space<vmem>>, vector<8x256xf32>
    %c0_1 = arith.constant 0 : index
    %c0_2 = arith.constant 0 : index
    %1 = vector.load %arg4[%c0_1, %c0_2] : memref<128x256xf32, #tpu.memory_space<vmem>>, vector<128x256xf32>
    %c0_3 = arith.constant 0 : index
    %c0_4 = arith.constant 0 : index
    %2 = vector.load %arg1[%c0_3, %c0_4] : memref<8x8xf32, #tpu.memory_space<vmem>>, vector<8x8xf32>
    %c0_5 = arith.constant 0 : index
    %c0_6 = arith.constant 0 : index
    %3 = vector.load %arg2[%c0_5, %c0_6] : memref<8x128xf32, #tpu.memory_space<vmem>>, vector<8x128xf32>
    %cst = arith.constant dense<0.000000e+00> : vector<8x256xf32>
    %4 = tpu.matmul %2, %0, %cst {dimension_numbers = #tpu.dot_dimension_numbers<[1], [0], [0], [1], [0, 0, 1, 1], [], []>} : vector<8x8xf32>, vector<8x256xf32>, vector<8x256xf32> -> vector<8x256xf32>
    %cst_7 = arith.constant dense<0.000000e+00> : vector<8x256xf32>
    %5 = tpu.matmul %3, %1, %cst_7 {dimension_numbers = #tpu.dot_dimension_numbers<[1], [0], [0], [1], [0, 0, 1, 1], [], []>} : vector<8x128xf32>, vector<128x256xf32>, vector<8x256xf32> -> vector<8x256xf32>
    %6 = arith.addf %4, %5 : vector<8x256xf32>
    %c0_8 = arith.constant 0 : index
    %c0_9 = arith.constant 0 : index
    %7 = vector.load %arg5[%c0_8, %c0_9] : memref<1x256xf32, #tpu.memory_space<vmem>>, vector<1x256xf32>
    %8 = vector.broadcast %7 : vector<1x256xf32> to vector<8x256xf32>
    %9 = arith.addf %6, %8 : vector<8x256xf32>
    %10 = vector.extract_strided_slice %9 {offsets = [0, 0], sizes = [8, 128], strides = [1, 1]} : vector<8x256xf32> to vector<8x128xf32>
    %11 = vector.extract_strided_slice %9 {offsets = [0, 128], sizes = [8, 128], strides = [1, 1]} : vector<8x256xf32> to vector<8x128xf32>
    %cst_10 = arith.constant 0.000000e+00 : f32
    %12 = vector.broadcast %cst_10 : f32 to vector<8x128xf32>
    %13 = arith.maximumf %10, %12 : vector<8x128xf32>
    %c0_11 = arith.constant 0 : index
    %c0_12 = arith.constant 0 : index
    %14 = vector.load %arg6[%c0_11, %c0_12] : memref<8x256xf32, #tpu.memory_space<vmem>>, vector<8x128xf32>
    tpu.vector_store %arg6[%c0_11, %c0_12], %13 {strides = array<i32>} : memref<8x256xf32, #tpu.memory_space<vmem>>, vector<8x128xf32>,
    %15 = tpu.iota {dimensions = array<i32: 1>} : vector<8x128xi32>
    %c4_i32 = arith.constant 4 : i32
    %16 = vector.broadcast %c4_i32 : i32 to vector<8x128xi32>
    %17 = arith.cmpi slt, %15, %16 : vector<8x128xi32>
    %cst_13 = arith.constant 0xFF800000 : f32
    %18 = vector.broadcast %cst_13 : f32 to vector<8x128xf32>
    %19 = arith.select %17, %11, %18 : vector<8x128xi1>, vector<8x128xf32>
    %cst_14 = arith.constant dense<0xFF800000> : vector<8xf32>
    %20 = vector.multi_reduction <maximumf>, %19, %cst_14 [1] : vector<8x128xf32> to vector<8xf32>
    %21 = vector.shape_cast %20 : vector<8xf32> to vector<8x1xf32>
    %22 = vector.broadcast %21 : vector<8x1xf32> to vector<8x128xf32>
    %23 = arith.subf %19, %22 : vector<8x128xf32>
    %24 = math.exp %23 : vector<8x128xf32>
    %cst_15 = arith.constant dense<0.000000e+00> : vector<8xf32>
    %25 = vector.multi_reduction <add>, %24, %cst_15 [1] : vector<8x128xf32> to vector<8xf32>
    %26 = vector.shape_cast %25 : vector<8xf32> to vector<8x1xf32>
    %27 = tpu.reciprocal %26 : vector<8x1xf32> -> vector<8x1xf32>
    %28 = vector.broadcast %27 : vector<8x1xf32> to vector<8x128xf32>
    %29 = arith.mulf %24, %28 : vector<8x128xf32>
    %c4_i32_16 = arith.constant 4 : i32
    %30 = vector.broadcast %c4_i32_16 : i32 to vector<8x128xi32>
    %31 = arith.cmpi eq, %15, %30 : vector<8x128xi32>
    %cst_17 = arith.constant 0.000000e+00 : f32
    %32 = vector.broadcast %cst_17 : f32 to vector<8x128xf32>
    %33 = arith.select %31, %11, %32 : vector<8x128xi1>, vector<8x128xf32>
    %34 = arith.select %17, %29, %33 : vector<8x128xi1>, vector<8x128xf32>
    %c0_18 = arith.constant 0 : index
    %c128 = arith.constant 128 : index
    %35 = vector.load %arg6[%c0_18, %c128] : memref<8x256xf32, #tpu.memory_space<vmem>>, vector<8x128xf32>
    tpu.vector_store %arg6[%c0_18, %c128], %34 {strides = array<i32>} : memref<8x256xf32, #tpu.memory_space<vmem>>, vector<8x128xf32>,
    return
  }
  func.func @transform_0(%arg0: i32) -> (i32, i32) {
    %c0_i32 = arith.constant 0 : i32
    %c0_i32_0 = arith.constant 0 : i32
    return %arg0, %c0_i32 : i32, i32
  }
  func.func @transform_1(%arg0: i32) -> (i32, i32) {
    %c0_i32 = arith.constant 0 : i32
    %c0_i32_0 = arith.constant 0 : i32
    return %arg0, %c0_i32 : i32, i32
  }
  func.func @transform_2(%arg0: i32) -> (i32, i32) {
    %c0_i32 = arith.constant 0 : i32
    %c0_i32_0 = arith.constant 0 : i32
    %c0_i32_1 = arith.constant 0 : i32
    return %c0_i32, %c0_i32_0 : i32, i32
  }
  func.func @transform_3(%arg0: i32) -> (i32, i32) {
    %c0_i32 = arith.constant 0 : i32
    %c0_i32_0 = arith.constant 0 : i32
    %c0_i32_1 = arith.constant 0 : i32
    return %c0_i32, %c0_i32_0 : i32, i32
  }
  func.func @transform_4(%arg0: i32) -> (i32, i32) {
    %c0_i32 = arith.constant 0 : i32
    %c0_i32_0 = arith.constant 0 : i32
    %c0_i32_1 = arith.constant 0 : i32
    return %c0_i32, %c0_i32_0 : i32, i32
  }
  func.func @transform_5(%arg0: i32) -> (i32, i32) {
    %c0_i32 = arith.constant 0 : i32
    %c0_i32_0 = arith.constant 0 : i32
    return %arg0, %c0_i32 : i32, i32
  }
}

</mosaic_0001>

<bundles_post_ra>
// kernel: _policy_forward_jit.1
= control target key start
LH: loop header
LB: loop body
LE: loop exit
PB: predicated region body
PF: predicated region fallthrough
CT: control target
= control target key end

     0   :  { %10 = vsyncpa [#allocation3], 0  ;;  %s321_s18 = smov [#allocation2]   ;;  %s390_s0 = inlined_call_operand.vmem [shape: f32[8,8], index: 0, kind: input, shape index: {}]   ;;  %s391_s1 = inlined_call_operand.vmem [shape: f32[8,128], index: 1, kind: input, shape index: {}]   ;;  %s392_s2 = inlined_call_operand.vmem [shape: f32[8,256], index: 2, kind: input, shape index: {}]   ;;  %s393_s3 = inlined_call_operand.hbm [shape: f32[128,256], index: 3, kind: input, shape index: {}]   ;;  %s394_s4 = inlined_call_operand.vmem [shape: f32[1,256], index: 4, kind: input, shape index: {}]   ;;  %s395_s5 = inlined_call_operand.vmem [shape: f32[8,256], index: 5, kind: output, shape index: {}]  }
   0x1   :  { %s22_s19 = sshll.u32 %s321_s18, 4  ;;  %s297_s22 = scalar_lea.hbm %s393_s3, 4096  ;;  %s23_s19 = int_to_ptr.vmem [resolvable:$true] %s22_s19 }
   0x2   :  { %p298_p0 = scmp.ne.s32.totalorder %s393_s3, %s297_s22  ;;  %p301_p1 = scmp.lt.u32.totalorder %s297_s22, %s393_s3 }
   0x4   :  { %p303_p2 = pnand %p301_p1, %p298_p0 }
   0x6   :  { %306 = shalt.err (!%p303_p2)
}
   0x7   :  { %s307_s27 = scalar_lea.vmem %s23_s19, 4096  ;;  %p312_p4 = scmp.lt.s32.totalorder %s23_s19, %s23_s19 }
   0x8   :  { %p308_p3 = scmp.ne.s32.totalorder %s23_s19, %s307_s27  ;;  %p313_p5 = scmp.lt.s32.totalorder %s307_s27, %s307_s27 }
   0xa   :  { %p314_p6 = por %p313_p5, %p312_p4 }
   0xc   :  { %p315_p7 = pnand %p314_p6, %p308_p3 }
   0xe   :  { %318 = shalt.err (!%p315_p7)
}
   0xf   :  { %s322_s28 = smov 256   ;;  %s323_s29 = smov 16  }
  0x10   :  { %28 = dma.hbm_to_vmem [thread:$0]  %s393_s3, 4096, %s23_s19, [#allocation3], %s322_s28, %s322_s28, %s323_s29  }
  0x11   :  { %319 = dma.done.wait [#allocation3], 4096  }
  0x12   :  { %320 = vsyncadd [#allocation3], 4294963200  ;;  %v324_v0 = vmov 0.0   ;;  %v37_v1 = vld [vmem:[#allocation2 + $0x8] sm:$0xff]  ;;  %v39_v2 = vld [vmem:[#allocation2 + $0x18] sm:$0xff]  ;;  %vm141_vm0 = vcmask 64512   ;;  %v218_v55 = vlaneseq }
  0x13   :  { %209 = vmatprep.mubr.f32.mxu0 %v324_v0  ;;  %134 = vmatprep.mubr.f32.mxu1 %v324_v0  ;;  %v36_v3 = vld [vmem:[#allocation2] sm:$0xff]  ;;  %v255_v4 = vpack.c.bf16 %v39_v2, %v37_v1  ;;  %v38_v5 = vld [vmem:[#allocation2 + $0x10] sm:$0xff]  ;;  %v41_v6 = vld [vmem:[#allocation2 + $0x28] sm:$0xff] }
  0x14   :  { %v43_v7 = vld [vmem:[#allocation2 + $0x38] sm:$0xff]  ;;  %v257_v8 = vpack.c.bf16 %v38_v5, %v36_v3  ;;  %v40_v10 = vld [vmem:[#allocation2 + $0x20] sm:$0xff]  ;;  %v42_v11 = vld [vmem:[#allocation2 + $0x30] sm:$0xff]  ;;  %v219_v56 = vshrl.u32 %v218_v55, 7  ;;  %v233_v61 = vand.u32 127, %v218_v55 }
  0x15   :  { %v259_v9 = vpack.c.bf16 %v43_v7, %v41_v6  ;;  %v45_v12 = vld [vmem:[#allocation2 + $0x48] sm:$0xff]  ;;  %256 = vmatprep.subr.bf16.mxu1 %v255_v4  ;;  %v47_v13 = vld [vmem:[#allocation2 + $0x58] sm:$0xff]  ;;  %v261_v14 = vpack.c.bf16 %v42_v11, %v40_v10  ;;  %v44_v16 = vld [vmem:[#allocation2 + $0x40] sm:$0xff] }
  0x16   :  { %258 = vmatpush1.bf16.msra.mxu1 %v257_v8  ;;  %v263_v15 = vpack.c.bf16 %v47_v13, %v45_v12  ;;  %v46_v17 = vld [vmem:[#allocation2 + $0x50] sm:$0xff]  ;;  %v49_v18 = vld [vmem:[#allocation2 + $0x68] sm:$0xff]  ;;  %v51_v19 = vld [vmem:[#allocation2 + $0x78] sm:$0xff]  ;;  %v220_v57 = vsub.s32 0, %v219_v56  ;;  %v224_v59 = vsub.s32 1, %v219_v56  ;;  %vm234_vm1 = vcmp.lt.s32.totalorder %v233_v61, 4 }
  0x17   :  { %260 = vmatprep.subr.bf16.mxu1 %v259_v9  ;;  %v265_v20 = vpack.c.bf16 %v46_v17, %v44_v16  ;;  %v267_v21 = vpack.c.bf16 %v51_v19, %v49_v18  ;;  %v48_v22 = vld [vmem:[#allocation2 + $0x60] sm:$0xff]  ;;  %v50_v23 = vld [vmem:[#allocation2 + $0x70] sm:$0xff]  ;;  %v53_v24 = vld [vmem:[#allocation2 + $0x88] sm:$0xff]  ;;  %vm245_vm2 = vcmp.eq.s32.totalorder %v233_v61, 4 }
  0x18   :  { %v55_v25 = vld [vmem:[#allocation2 + $0x98] sm:$0xff]  ;;  %v35_v26 = vld [vmem:[%s392_s2 + $0x8] sm:$0xff]  ;;  %v34_v27 = vld [vmem:[%s392_s2] sm:$0xff]  ;;  %v269_v29 = vpack.c.bf16 %v50_v23, %v48_v22 }
  0x19   :  { %145 = vmatprep.subr.mxu0 %v35_v26  ;;  %v68_v28 = vld [vmem:[%s390_s0] sm:$0xff]  ;;  %v271_v30 = vpack.c.bf16 %v55_v25, %v53_v24  ;;  %v54_v32 = vld [vmem:[#allocation2 + $0x90] sm:$0xff]  ;;  %v57_v33 = vld [vmem:[#allocation2 + $0xa8] sm:$0xff] }
  0x1a   :  { %262 = vmatpush1.bf16.msra.mxu1 %v261_v14  ;;  %146 = vmatpush1.msra.mxu0 %v34_v27  ;;  %v52_v31 = vld [vmem:[#allocation2 + $0x80] sm:$0xff]  ;;  %v59_v34 = vld [vmem:[#allocation2 + $0xb8] sm:$0xff]  ;;  %v58_v38 = vld [vmem:[#allocation2 + $0xb0] sm:$0xff] }
  0x1b   :  { %264 = vmatprep.subr.bf16.mxu1 %v263_v15  ;;  %254 = vmatmul.mubr.msk.f32.vlgmr.msra.gmra.mrb[0].mxu0 %vm141_vm0, %v68_v28  ;;  %v273_v35 = vpack.c.bf16 %v54_v32, %v52_v31  ;;  %v275_v36 = vpack.c.bf16 %v59_v34, %v57_v33  ;;  %v56_v37 = vld [vmem:[#allocation2 + $0xa0] sm:$0xff]  ;;  %v61_v39 = vld [vmem:[#allocation2 + $0xc8] sm:$0xff]  ;;  %v63_v40 = vld [vmem:[#allocation2 + $0xd8] sm:$0xff] }
  0x1c   :  { %v277_v41 = vpack.c.bf16 %v58_v38, %v56_v37  ;;  %v279_v42 = vpack.c.bf16 %v63_v40, %v61_v39  ;;  %v60_v43 = vld [vmem:[#allocation2 + $0xc0] sm:$0xff]  ;;  %v62_v44 = vld [vmem:[#allocation2 + $0xd0] sm:$0xff]  ;;  %v65_v45 = vld [vmem:[#allocation2 + $0xe8] sm:$0xff] }
  0x1d   :  { %v67_v46 = vld [vmem:[#allocation2 + $0xf8] sm:$0xff]  ;;  %v281_v47 = vpack.c.bf16 %v62_v44, %v60_v43  ;;  %v64_v49 = vld [vmem:[#allocation2 + $0xe0] sm:$0xff]  ;;  %v66_v50 = vld [vmem:[#allocation2 + $0xf0] sm:$0xff] }
  0x1e   :  { %266 = vmatpush1.bf16.msra.mxu1 %v265_v20  ;;  %v283_v48 = vpack.c.bf16 %v67_v46, %v65_v45  ;;  %v285_v51 = vpack.c.bf16 %v66_v50, %v64_v49  ;;  %v69_v52 = vld [vmem:[%s391_s1] sm:$0xff] }
  0x1f   :  { %268 = vmatprep.subr.bf16.mxu1 %v267_v21  ;;  %v216_v58 = vld [vmem:[%s394_s4] sm:$0x3] }
  0x20   :  { %v221_v60 = vrot.slane %v216_v58, %v220_v57  ;;  %v225_v63 = vrot.slane %v216_v58, %v224_v59 }
  0x22   :  { %270 = vmatpush1.bf16.msra.mxu1 %v269_v29 }
  0x23   :  { %272 = vmatprep.subr.bf16.mxu1 %v271_v30 }
  0x26   :  { %274 = vmatpush1.bf16.msra.mxu1 %v273_v35 }
  0x27   :  { %276 = vmatprep.subr.bf16.mxu1 %v275_v36 }
  0x2a   :  { %278 = vmatpush1.bf16.msra.mxu1 %v277_v41 }
  0x2b   :  { %280 = vmatprep.subr.bf16.mxu1 %v279_v42 }
  0x2e   :  { %282 = vmatpush1.bf16.msra.mxu1 %v281_v47 }
  0x2f   :  { %284 = vmatprep.subr.bf16.mxu1 %v283_v48 }
  0x32   :  { %286 = vmatpush1.bf16.msra.mxu1 %v285_v51 }
  0x35   :  { %135 = vmatmul.mubr.f32.vlgmr.msra.gmra.mrb[0].mxu1 %v69_v52 }
  0xee   :  { %v211_v53 = vpop.f32.mrb[0].mxu0 }
  0xef   :  { %v213_v54 = vpop.f32.mrb[1].mxu0 }
 0x108   :  { %v136_v62 = vpop.f32.mrb[0].mxu1 }
 0x109   :  { %v212_v0 = vadd.f32 %v211_v53, %v136_v62  ;;  %v138_v1 = vpop.f32.mrb[1].mxu1 }
 0x10a   :  { %v214_v2 = vadd.f32 %v213_v54, %v138_v1 }
 0x10b   :  { %v228_v3 = vadd.f32 %v221_v60, %v212_v0 }
 0x10c   :  { %v229_v4 = vadd.f32 %v225_v63, %v214_v2 }
 0x10d   :  { %v230_v5 = vmax.f32 %v228_v3, 0.0 }
 0x10e   :  { %v235_v6 = vsel %vm234_vm1, %v229_v4, -inf  ;;  %v246_v7 = vsel %vm245_vm2, %v229_v4, 0.0 }
 0x10f   :  { %231 = vst [vmem:[%s395_s5] sm:$0xff] %v230_v5  ;;  %236 = vmax.xlane.f32.xlu0 %v235_v6 }
 0x19c   :  { %v237_v8 = vpop.xlane.xlu0 %236 }
 0x19d   :  { %v238_v9 = vsub.f32 %v235_v6, %v237_v8 }
 0x19f   :  { %v239_v10 = vmul.f32 1.442695, %v238_v9 }
 0x1a1   :  { %293 = vpow2.f32 %v239_v10 }
 0x1ab   :  { %v294_v11 = vpop.eup %293 }
 0x1ac   :  { %241 = vadd.xlane.f32.xlu0 %v294_v11 }
 0x239   :  { %v242_v12 = vpop.xlane.xlu0 %241 }
 0x23a   :  { %295 = vrcp.f32 %v242_v12 }
 0x244   :  { %v296_v13 = vpop.eup %295 }
 0x245   :  { %v244_v14 = vmul.f32 %v296_v13, %v294_v11 }
 0x247   :  { %v247_v15 = vsel %vm234_vm1, %v244_v14, %v246_v7 }
 0x248   :  { %248 = vst [vmem:[%s395_s5 + $0x8] sm:$0xff] %v247_v15 }
 0x249   :  { %253 = vsyncpa [#allocation3], 1 }

</bundles_post_ra>
